<compile_context>
chip_gen: v6e
topology: v6e:2x2x1
jax: 0.10.0
libtpu: 0.0.40
codegen_flags: <defaults>
</compile_context>

<pallas_src>
import jax
import jax.numpy as jnp
from jax.experimental import pallas as pl
from jax.experimental.pallas import tpu as pltpu

LANE = 128  # TPU lane width (last-dim tile)


def _round_up(n, m):
    return ((n + m - 1) // m) * m


def _choose_tile_b(B):
    # Small batches: a single tile rounded up to the f32 sublane multiple (8);
    # splitting would only add ~0.35 us/step overhead.
    if B <= 256:
        return _round_up(B, 8)
    # Large batches: MXU-aligned 128-row tiles, capped at 512 rows, with at
    # least 2 grid steps so the "parallel" axis feeds both v7x TensorCores.
    half = _round_up(pl.cdiv(B, 2), 128)
    return max(128, min(512, half))


def perturber_kernel(x_ref,
                     w1_ref, b1_ref,
                     w2_ref, b2_ref,
                     w3_ref, b3_ref,
                     w4_ref, b4_ref,
                     o_ref):
    # Fused 4-layer MLP: matmuls on the MXU (f32 accumulation), bias add + ReLU
    # on the VPU in f32; activations cast to the weight dtype (f32 or bf16)
    # right before each dot.
    wdt = w1_ref.dtype
    x = x_ref[...].astype(wdt)
    h = jnp.dot(x, w1_ref[...], preferred_element_type=jnp.float32) + b1_ref[...]
    h = jnp.maximum(h, 0.0)
    h = jnp.dot(h.astype(wdt), w2_ref[...], preferred_element_type=jnp.float32) + b2_ref[...]
    h = jnp.maximum(h, 0.0)
    h = jnp.dot(h.astype(wdt), w3_ref[...], preferred_element_type=jnp.float32) + b3_ref[...]
    h = jnp.maximum(h, 0.0)
    y = jnp.dot(h.astype(wdt), w4_ref[...], preferred_element_type=jnp.float32) + b4_ref[...]
    o_ref[...] = y.astype(o_ref.dtype)


def init_perturber_params(key, D, HP, dtype=jnp.float32):
    """PyTorch-Linear-like init: W ~ U[-1/sqrt(fan_in), 1/sqrt(fan_in)]."""
    keys = jax.random.split(key, 8)

    def lin(kw, kb, fan_in, fan_out):
        bound = 1.0 / jnp.sqrt(fan_in)
        w = jax.random.uniform(kw, (fan_in, fan_out), dtype, -bound, bound)
        b = jax.random.uniform(kb, (1, fan_out), dtype, -bound, bound)
        return w, b

    w1, b1 = lin(keys[0], keys[1], D, HP)
    w2, b2 = lin(keys[2], keys[3], HP, HP)
    w3, b3 = lin(keys[4], keys[5], HP, HP)
    w4, b4 = lin(keys[6], keys[7], HP, D)
    return dict(w1=w1, b1=b1, w2=w2, b2=b2, w3=w3, b3=b3, w4=w4, b4=b4)


def pad_perturber_params(params, weight_dtype=None):
    """Zero-pad feature dims up to the 128-lane width (done once, outside the
    kernel). Zero padding is exact: padded lanes stay zero through bias + ReLU
    and are sliced off at the end. Optionally cast weights to bf16 for the MXU
    (biases stay f32)."""
    D, HP = params["w1"].shape
    Dp, HPp = _round_up(D, LANE), _round_up(HP, LANE)

    def pad_w(w, rp, cp):
        r, c = w.shape
        w = jnp.pad(w, ((0, rp - r), (0, cp - c)))
        return w.astype(weight_dtype) if weight_dtype is not None else w

    def pad_b(b, cp):
        return jnp.pad(b, ((0, 0), (0, cp - b.shape[1]))).astype(jnp.float32)

    return dict(
        w1=pad_w(params["w1"], Dp, HPp), b1=pad_b(params["b1"], HPp),
        w2=pad_w(params["w2"], HPp, HPp), b2=pad_b(params["b2"], HPp),
        w3=pad_w(params["w3"], HPp, HPp), b3=pad_b(params["b3"], HPp),
        w4=pad_w(params["w4"], HPp, Dp), b4=pad_b(params["b4"], Dp),
    )


def perturber_forward(x, pparams, *, tile_b=None):
    """x: (B, D) float32. pparams: output of pad_perturber_params."""
    B, D = x.shape
    Dp, HPp = pparams["w1"].shape

    if tile_b is None:
        tile_b = _choose_tile_b(B)
    tile_b = _round_up(min(tile_b, max(B, 8)), 8)

    # Pad batch to a multiple of tile_b (no ragged last tile) and features to
    # the lane-padded width; padded rows/lanes are sliced off below.
    Bp = _round_up(B, tile_b)
    x_p = x if (Bp == B and Dp == D) else jnp.pad(x, ((0, Bp - B), (0, Dp - D)))

    grid = (Bp // tile_b,)
    repl = lambda i: (0, 0)  # weights/biases are grid-invariant (resident)

    wbytes = sum(int(pparams[k].size) * pparams[k].dtype.itemsize
                 for k in ("w1", "w2", "w3", "w4", "b1", "b2", "b3", "b4"))
    xbytes = Bp * Dp * x.dtype.itemsize
    flops = 2 * Bp * (Dp * HPp + 2 * HPp * HPp + HPp * Dp)
    cost = pl.CostEstimate(flops=flops, transcendentals=0,
                           bytes_accessed=wbytes + 2 * xbytes)

    # Rough VMEM budget: double-buffered weights + double-buffered x/out tiles,
    # capped at v7x's 64 MiB physical VMEM.
    vmem_need = 2 * wbytes + 4 * tile_b * max(Dp, HPp) * 4 + (2 << 20)
    vmem_limit = int(min(max(vmem_need, 32 * 1024 * 1024), 64 * 1024 * 1024))

    out = pl.pallas_call(
        perturber_kernel,
        out_shape=jax.ShapeDtypeStruct((Bp, Dp), x.dtype),
        grid_spec=pltpu.PrefetchScalarGridSpec(
            num_scalar_prefetch=0,
            grid=grid,
            in_specs=[
                pl.BlockSpec((tile_b, Dp), lambda i: (i, 0)),  # x tile
                pl.BlockSpec((Dp, HPp), repl),                 # w1
                pl.BlockSpec((1, HPp), repl),                  # b1
                pl.BlockSpec((HPp, HPp), repl),                # w2
                pl.BlockSpec((1, HPp), repl),                  # b2
                pl.BlockSpec((HPp, HPp), repl),                # w3
                pl.BlockSpec((1, HPp), repl),                  # b3
                pl.BlockSpec((HPp, Dp), repl),                 # w4
                pl.BlockSpec((1, Dp), repl),                   # b4
            ],
            out_specs=pl.BlockSpec((tile_b, Dp), lambda i: (i, 0)),
        ),
        compiler_params=pltpu.CompilerParams(
            dimension_semantics=("parallel",),
            vmem_limit_bytes=vmem_limit),
        cost_estimate=cost,
    )(x_p,
      pparams["w1"], pparams["b1"],
      pparams["w2"], pparams["b2"],
      pparams["w3"], pparams["b3"],
      pparams["w4"], pparams["b4"])

    return out[:B, :D]


def perturber_ref(x, p):
    """Pure-JAX reference (unpadded params) for correctness checking."""
    h = jnp.maximum(x @ p["w1"] + p["b1"], 0.0)
    h = jnp.maximum(h @ p["w2"] + p["b2"], 0.0)
    h = jnp.maximum(h @ p["w3"] + p["b3"], 0.0)
    return h @ p["w4"] + p["b4"]


if __name__ == "__main__":
    D, HP = 32, 64
    B = 8

    key = jax.random.PRNGKey(0)
    kx, kp = jax.random.split(key)
    x = jax.random.normal(kx, (B, D), dtype=jnp.float32)
    params = init_perturber_params(kp, D, HP)
    ref = perturber_ref(x, params)

    # f32 path (exact vs reference).
    pparams = pad_perturber_params(params)
    out = jax.block_until_ready(perturber_forward(x, pparams))
    assert out.shape == (B, D)
    assert jnp.allclose(out, ref, atol=1e-5, rtol=1e-5), "f32 mismatch vs reference"

    # Multi-tile path: B not a multiple of tile_b exercises batch padding + grid.
    B2 = 40
    x2 = jax.random.normal(jax.random.PRNGKey(1), (B2, D), dtype=jnp.float32)
    out2 = jax.block_until_ready(perturber_forward(x2, pparams, tile_b=16))
    ref2 = perturber_ref(x2, params)
    assert out2.shape == (B2, D)
    assert jnp.allclose(out2, ref2, atol=1e-5, rtol=1e-5), "tiled mismatch vs reference"

    # bf16-weight MXU path (f32 accumulation, f32 bias/ReLU) — loose tolerance.
    pparams_bf16 = pad_perturber_params(params, weight_dtype=jnp.bfloat16)
    out_bf16 = jax.block_until_ready(perturber_forward(x, pparams_bf16))
    assert out_bf16.shape == (B, D)
    assert jnp.allclose(out_bf16, ref, atol=1e-1, rtol=1e-1), "bf16 mismatch vs reference"

    print("KERNEL_OK")
</pallas_src>

<mosaic_0001>
module attributes {stable_mosaic.version = 11 : i64} {
  func.func @perturber_kernel(%arg0: i32, %arg1: memref<8x128xf32, #tpu.memory_space<vmem>>, %arg2: memref<128x128xf32, #tpu.memory_space<vmem>>, %arg3: memref<1x128xf32, #tpu.memory_space<vmem>>, %arg4: memref<128x128xf32, #tpu.memory_space<vmem>>, %arg5: memref<1x128xf32, #tpu.memory_space<vmem>>, %arg6: memref<128x128xf32, #tpu.memory_space<vmem>>, %arg7: memref<1x128xf32, #tpu.memory_space<vmem>>, %arg8: memref<128x128xf32, #tpu.memory_space<vmem>>, %arg9: memref<1x128xf32, #tpu.memory_space<vmem>>, %arg10: memref<8x128xf32, #tpu.memory_space<vmem>>) attributes {dimension_semantics = [#tpu.dimension_semantics<parallel>], iteration_bounds = array<i64: 1>, scalar_prefetch = 0 : i64, scratch_operands = 0 : i64, tpu.core_type = #tpu.core_type<tc>, window_params = [{transform_indices = @transform_0, window_bounds = array<i64: 8, 128>}, {pipeline_mode = #tpu.pipeline_mode<synchronous>, transform_indices = @transform_1, window_bounds = array<i64: 128, 128>}, {pipeline_mode = #tpu.pipeline_mode<synchronous>, transform_indices = @transform_2, window_bounds = array<i64: 1, 128>}, {pipeline_mode = #tpu.pipeline_mode<synchronous>, transform_indices = @transform_3, window_bounds = array<i64: 128, 128>}, {pipeline_mode = #tpu.pipeline_mode<synchronous>, transform_indices = @transform_4, window_bounds = array<i64: 1, 128>}, {pipeline_mode = #tpu.pipeline_mode<synchronous>, transform_indices = @transform_5, window_bounds = array<i64: 128, 128>}, {pipeline_mode = #tpu.pipeline_mode<synchronous>, transform_indices = @transform_6, window_bounds = array<i64: 1, 128>}, {pipeline_mode = #tpu.pipeline_mode<synchronous>, transform_indices = @transform_7, window_bounds = array<i64: 128, 128>}, {pipeline_mode = #tpu.pipeline_mode<synchronous>, transform_indices = @transform_8, window_bounds = array<i64: 1, 128>}, {transform_indices = @transform_9, window_bounds = array<i64: 8, 128>}]} {
    %c0 = arith.constant 0 : index
    %c0_0 = arith.constant 0 : index
    %0 = vector.load %arg1[%c0, %c0_0] : memref<8x128xf32, #tpu.memory_space<vmem>>, vector<8x128xf32>
    %c0_1 = arith.constant 0 : index
    %c0_2 = arith.constant 0 : index
    %1 = vector.load %arg2[%c0_1, %c0_2] : memref<128x128xf32, #tpu.memory_space<vmem>>, vector<128x128xf32>
    %cst = arith.constant dense<0.000000e+00> : vector<8x128xf32>
    %2 = tpu.matmul %0, %1, %cst {dimension_numbers = #tpu.dot_dimension_numbers<[1], [0], [0], [1], [0, 0, 1, 1], [], []>} : vector<8x128xf32>, vector<128x128xf32>, vector<8x128xf32> -> vector<8x128xf32>
    %c0_3 = arith.constant 0 : index
    %c0_4 = arith.constant 0 : index
    %3 = vector.load %arg3[%c0_3, %c0_4] : memref<1x128xf32, #tpu.memory_space<vmem>>, vector<1x128xf32>
    %4 = vector.broadcast %3 : vector<1x128xf32> to vector<8x128xf32>
    %5 = arith.addf %2, %4 : vector<8x128xf32>
    %cst_5 = arith.constant 0.000000e+00 : f32
    %6 = vector.broadcast %cst_5 : f32 to vector<8x128xf32>
    %7 = arith.maximumf %5, %6 : vector<8x128xf32>
    %c0_6 = arith.constant 0 : index
    %c0_7 = arith.constant 0 : index
    %8 = vector.load %arg4[%c0_6, %c0_7] : memref<128x128xf32, #tpu.memory_space<vmem>>, vector<128x128xf32>
    %cst_8 = arith.constant dense<0.000000e+00> : vector<8x128xf32>
    %9 = tpu.matmul %7, %8, %cst_8 {dimension_numbers = #tpu.dot_dimension_numbers<[1], [0], [0], [1], [0, 0, 1, 1], [], []>} : vector<8x128xf32>, vector<128x128xf32>, vector<8x128xf32> -> vector<8x128xf32>
    %c0_9 = arith.constant 0 : index
    %c0_10 = arith.constant 0 : index
    %10 = vector.load %arg5[%c0_9, %c0_10] : memref<1x128xf32, #tpu.memory_space<vmem>>, vector<1x128xf32>
    %11 = vector.broadcast %10 : vector<1x128xf32> to vector<8x128xf32>
    %12 = arith.addf %9, %11 : vector<8x128xf32>
    %cst_11 = arith.constant 0.000000e+00 : f32
    %13 = vector.broadcast %cst_11 : f32 to vector<8x128xf32>
    %14 = arith.maximumf %12, %13 : vector<8x128xf32>
    %c0_12 = arith.constant 0 : index
    %c0_13 = arith.constant 0 : index
    %15 = vector.load %arg6[%c0_12, %c0_13] : memref<128x128xf32, #tpu.memory_space<vmem>>, vector<128x128xf32>
    %cst_14 = arith.constant dense<0.000000e+00> : vector<8x128xf32>
    %16 = tpu.matmul %14, %15, %cst_14 {dimension_numbers = #tpu.dot_dimension_numbers<[1], [0], [0], [1], [0, 0, 1, 1], [], []>} : vector<8x128xf32>, vector<128x128xf32>, vector<8x128xf32> -> vector<8x128xf32>
    %c0_15 = arith.constant 0 : index
    %c0_16 = arith.constant 0 : index
    %17 = vector.load %arg7[%c0_15, %c0_16] : memref<1x128xf32, #tpu.memory_space<vmem>>, vector<1x128xf32>
    %18 = vector.broadcast %17 : vector<1x128xf32> to vector<8x128xf32>
    %19 = arith.addf %16, %18 : vector<8x128xf32>
    %cst_17 = arith.constant 0.000000e+00 : f32
    %20 = vector.broadcast %cst_17 : f32 to vector<8x128xf32>
    %21 = arith.maximumf %19, %20 : vector<8x128xf32>
    %c0_18 = arith.constant 0 : index
    %c0_19 = arith.constant 0 : index
    %22 = vector.load %arg8[%c0_18, %c0_19] : memref<128x128xf32, #tpu.memory_space<vmem>>, vector<128x128xf32>
    %cst_20 = arith.constant dense<0.000000e+00> : vector<8x128xf32>
    %23 = tpu.matmul %21, %22, %cst_20 {dimension_numbers = #tpu.dot_dimension_numbers<[1], [0], [0], [1], [0, 0, 1, 1], [], []>} : vector<8x128xf32>, vector<128x128xf32>, vector<8x128xf32> -> vector<8x128xf32>
    %c0_21 = arith.constant 0 : index
    %c0_22 = arith.constant 0 : index
    %24 = vector.load %arg9[%c0_21, %c0_22] : memref<1x128xf32, #tpu.memory_space<vmem>>, vector<1x128xf32>
    %25 = vector.broadcast %24 : vector<1x128xf32> to vector<8x128xf32>
    %26 = arith.addf %23, %25 : vector<8x128xf32>
    %c0_23 = arith.constant 0 : index
    %c0_24 = arith.constant 0 : index
    %27 = vector.load %arg10[%c0_23, %c0_24] : memref<8x128xf32, #tpu.memory_space<vmem>>, vector<8x128xf32>
    tpu.vector_store %arg10[%c0_23, %c0_24], %26 {strides = array<i32>} : memref<8x128xf32, #tpu.memory_space<vmem>>, vector<8x128xf32>,
    return
  }
  func.func @transform_0(%arg0: i32) -> (i32, i32) {
    %c0_i32 = arith.constant 0 : i32
    %c0_i32_0 = arith.constant 0 : i32
    return %arg0, %c0_i32 : i32, i32
  }
  func.func @transform_1(%arg0: i32) -> (i32, i32) {
    %c0_i32 = arith.constant 0 : i32
    %c0_i32_0 = arith.constant 0 : i32
    %c0_i32_1 = arith.constant 0 : i32
    return %c0_i32, %c0_i32_0 : i32, i32
  }
  func.func @transform_2(%arg0: i32) -> (i32, i32) {
    %c0_i32 = arith.constant 0 : i32
    %c0_i32_0 = arith.constant 0 : i32
    %c0_i32_1 = arith.constant 0 : i32
    return %c0_i32, %c0_i32_0 : i32, i32
  }
  func.func @transform_3(%arg0: i32) -> (i32, i32) {
    %c0_i32 = arith.constant 0 : i32
    %c0_i32_0 = arith.constant 0 : i32
    %c0_i32_1 = arith.constant 0 : i32
    return %c0_i32, %c0_i32_0 : i32, i32
  }
  func.func @transform_4(%arg0: i32) -> (i32, i32) {
    %c0_i32 = arith.constant 0 : i32
    %c0_i32_0 = arith.constant 0 : i32
    %c0_i32_1 = arith.constant 0 : i32
    return %c0_i32, %c0_i32_0 : i32, i32
  }
  func.func @transform_5(%arg0: i32) -> (i32, i32) {
    %c0_i32 = arith.constant 0 : i32
    %c0_i32_0 = arith.constant 0 : i32
    %c0_i32_1 = arith.constant 0 : i32
    return %c0_i32, %c0_i32_0 : i32, i32
  }
  func.func @transform_6(%arg0: i32) -> (i32, i32) {
    %c0_i32 = arith.constant 0 : i32
    %c0_i32_0 = arith.constant 0 : i32
    %c0_i32_1 = arith.constant 0 : i32
    return %c0_i32, %c0_i32_0 : i32, i32
  }
  func.func @transform_7(%arg0: i32) -> (i32, i32) {
    %c0_i32 = arith.constant 0 : i32
    %c0_i32_0 = arith.constant 0 : i32
    %c0_i32_1 = arith.constant 0 : i32
    return %c0_i32, %c0_i32_0 : i32, i32
  }
  func.func @transform_8(%arg0: i32) -> (i32, i32) {
    %c0_i32 = arith.constant 0 : i32
    %c0_i32_0 = arith.constant 0 : i32
    %c0_i32_1 = arith.constant 0 : i32
    return %c0_i32, %c0_i32_0 : i32, i32
  }
  func.func @transform_9(%arg0: i32) -> (i32, i32) {
    %c0_i32 = arith.constant 0 : i32
    %c0_i32_0 = arith.constant 0 : i32
    return %arg0, %c0_i32 : i32, i32
  }
}

</mosaic_0001>

<bundles_post_ra>
// kernel: tpu_custom_call.1
= control target key start
LH: loop header
LB: loop body
LE: loop exit
PB: predicated region body
PF: predicated region fallthrough
CT: control target
= control target key end

     0   :  { %14 = vsyncpa [#allocation3], 0  ;;  %s1017_s0 = inlined_call_operand.hbm [shape: f32[8,128], index: 0, kind: input, shape index: {}]   ;;  %s1018_s1 = inlined_call_operand.hbm [shape: f32[128,128], index: 1, kind: input, shape index: {}]   ;;  %s1019_s2 = inlined_call_operand.vmem [shape: f32[1,128], index: 2, kind: input, shape index: {}]   ;;  %s1020_s3 = inlined_call_operand.hbm [shape: f32[128,128], index: 3, kind: input, shape index: {}]   ;;  %s1021_s4 = inlined_call_operand.vmem [shape: f32[1,128], index: 4, kind: input, shape index: {}]   ;;  %s1022_s5 = inlined_call_operand.hbm [shape: f32[128,128], index: 5, kind: input, shape index: {}]   ;;  %s1023_s6 = inlined_call_operand.vmem [shape: f32[1,128], index: 6, kind: input, shape index: {}]   ;;  %s1024_s7 = inlined_call_operand.hbm [shape: f32[128,128], index: 7, kind: input, shape index: {}]   ;;  %s1025_s8 = inlined_call_operand.vmem [shape: f32[1,128], index: 8, kind: input, shape index: {}]   ;;  %s1026_s9 = inlined_call_operand.hbm [shape: f32[8,128], index: 9, kind: output, shape index: {}]  }
   0x1   :  { %15 = vsyncpa [#allocation6], 0 }
   0x2   :  { %16 = vsyncpa [#allocation9], 0 }
   0x3   :  { %17 = vsyncpa [#allocation4], 0  ;;  %s843_s30 = smov [#allocation5]  }
   0x4   :  { %s33_s10 = sshll.u32 %s843_s30, 4  ;;  %s34_s10 = int_to_ptr.vmem [resolvable:$true] %s33_s10 }
   0x5   :  { %s723_s11 = scalar_lea.vmem %s34_s10, 2048  ;;  %p728_p1 = scmp.lt.s32.totalorder %s34_s10, %s34_s10 }
   0x6   :  { %p724_p0 = scmp.ne.s32.totalorder %s34_s10, %s723_s11  ;;  %p729_p2 = scmp.lt.s32.totalorder %s723_s11, %s723_s11 }
   0x8   :  { %p730_p3 = por %p729_p2, %p728_p1 }
   0xa   :  { %p731_p4 = pnand %p730_p3, %p724_p0 }
   0xc   :  { %734 = shalt.err (!%p731_p4)
}
   0xd   :  { %s844_s12 = smov 128   ;;  %s845_s13 = smov 8  }
   0xe   :  { %39 = dma.hbm_to_vmem [thread:$0]  %s1018_s1, 2048, %s34_s10, [#allocation6], %s844_s12, %s844_s12, %s845_s13  }
   0xf   :  { %s846_s16 = smov [#allocation8]   ;;  %s847_s18 = smov [#allocation2]  }
  0x10   :  { %s61_s17 = sshll.u32 %s846_s16, 4  ;;  %s24_s19 = sshll.u32 %s847_s18, 4  ;;  %s62_s17 = int_to_ptr.vmem [resolvable:$true] %s61_s17  ;;  %s25_s19 = int_to_ptr.vmem [resolvable:$true] %s24_s19 }
  0x11   :  { %s743_s20 = scalar_lea.vmem %s62_s17, 2048  ;;  %p748_p6 = scmp.lt.s32.totalorder %s62_s17, %s62_s17 }
  0x12   :  { %p744_p5 = scmp.ne.s32.totalorder %s62_s17, %s743_s20  ;;  %p749_p7 = scmp.lt.s32.totalorder %s743_s20, %s743_s20 }
  0x14   :  { %p750_p8 = por %p749_p7, %p748_p6 }
  0x16   :  { %p751_p9 = pnand %p750_p8, %p744_p5 }
  0x18   :  { %754 = shalt.err (!%p751_p9)
}
  0x19   :  { %67 = dma.hbm_to_vmem [thread:$0]  %s1022_s5, 2048, %s62_s17, [#allocation9], %s844_s12, %s844_s12, %s845_s13  }
  0x1a   :  { %s763_s1 = scalar_lea.vmem %s25_s19, 128  ;;  %p768_p11 = scmp.lt.s32.totalorder %s25_s19, %s25_s19 }
  0x1b   :  { %p764_p10 = scmp.ne.s32.totalorder %s25_s19, %s763_s1  ;;  %p769_p12 = scmp.lt.s32.totalorder %s763_s1, %s763_s1 }
  0x1d   :  { %p770_p13 = por %p769_p12, %p768_p11 }
  0x1f   :  { %p771_p0 = pnand %p770_p13, %p764_p10 }
  0x21   :  { %774 = shalt.err (!%p771_p0)
}
  0x22   :  { %27 = dma.hbm_to_vmem [thread:$0]  %s1017_s0, 128, %s25_s19, [#allocation3]  }
  0x23   :  { %s848_s25 = smov [#allocation7]   ;;  %s849_s27 = smov [#allocation10]  }
  0x24   :  { %s47_s26 = sshll.u32 %s848_s25, 4  ;;  %s75_s28 = sshll.u32 %s849_s27, 4  ;;  %s48_s26 = int_to_ptr.vmem [resolvable:$true] %s47_s26  ;;  %s76_s28 = int_to_ptr.vmem [resolvable:$true] %s75_s28 }
  0x25   :  { %s783_s29 = scalar_lea.vmem %s48_s26, 2048  ;;  %p788_p2 = scmp.lt.s32.totalorder %s48_s26, %s48_s26 }
  0x26   :  { %p784_p1 = scmp.ne.s32.totalorder %s48_s26, %s783_s29  ;;  %p789_p3 = scmp.lt.s32.totalorder %s783_s29, %s783_s29 }
  0x28   :  { %p790_p4 = por %p789_p3, %p788_p2 }
  0x2a   :  { %p791_p5 = pnand %p790_p4, %p784_p1 }
  0x2c   :  { %794 = shalt.err (!%p791_p5)
}
  0x2d   :  { %53 = dma.hbm_to_vmem [thread:$0]  %s1020_s3, 2048, %s48_s26, [#allocation6], %s844_s12, %s844_s12, %s845_s13  }
  0x2e   :  { %s803_s0 = scalar_lea.vmem %s76_s28, 2048  ;;  %p808_p7 = scmp.lt.s32.totalorder %s76_s28, %s76_s28 }
  0x2f   :  { %p804_p6 = scmp.ne.s32.totalorder %s76_s28, %s803_s0  ;;  %p809_p8 = scmp.lt.s32.totalorder %s803_s0, %s803_s0 }
  0x31   :  { %p810_p9 = por %p809_p8, %p808_p7 }
  0x33   :  { %p811_p10 = pnand %p810_p9, %p804_p6 }
  0x35   :  { %814 = shalt.err (!%p811_p10)
}
  0x36   :  { %81 = dma.hbm_to_vmem [thread:$0]  %s1024_s7, 2048, %s76_s28, [#allocation9], %s844_s12, %s844_s12, %s845_s13  }
  0x37   :  { %835 = dma.done.wait [#allocation3], 128  }
  0x38   :  { %836 = vsyncadd [#allocation3], 4294967168 }
  0x39   :  { %837 = dma.done.wait [#allocation6], 4096  }
  0x3a   :  { %838 = vsyncadd [#allocation6], 4294963200 }
  0x3b   :  { %839 = dma.done.wait [#allocation9], 4096  }
  0x3c   :  { %840 = vsyncadd [#allocation9], 4294963200  ;;  %v850_v0 = vmov 0.0   ;;  %vm851_vm0 = vmmov 0   ;;  %v115_v1 = vld [vmem:[#allocation5 + $0x78] sm:$0xff]  ;;  %v114_v2 = vld [vmem:[#allocation5 + $0x70] sm:$0xff] }
  0x3d   :  { %565 = vmatprep.subr.mxu0 %v850_v0  ;;  %597 = vmatprep.mubr.msk.f32.mxu0 %vm851_vm0, %v850_v0  ;;  %v113_v3 = vld [vmem:[#allocation5 + $0x68] sm:$0xff]  ;;  %v112_v4 = vld [vmem:[#allocation5 + $0x60] sm:$0xff]  ;;  %v209_v5 = vld [vmem:[#allocation7 + $0x78] sm:$0xff]  ;;  %s852_s16 = smov [#allocation11]  }
  0x3e   :  { %600 = vmatprep.subr.mxu1 %v850_v0  ;;  %632 = vmatprep.mubr.msk.f32.mxu1 %vm851_vm0, %v850_v0  ;;  %v111_v6 = vld [vmem:[#allocation5 + $0x58] sm:$0xff]  ;;  %v208_v7 = vld [vmem:[#allocation7 + $0x70] sm:$0xff]  ;;  %v207_v8 = vld [vmem:[#allocation7 + $0x68] sm:$0xff]  ;;  %s482_s17 = sshll.u32 %s852_s16, 4  ;;  %s483_s17 = int_to_ptr.vmem [resolvable:$true] %s482_s17 }
  0x3f   :  { %566 = vmatpush3.msra.mxu0 %v115_v1  ;;  %601 = vmatpush3.msra.mxu1 %v209_v5  ;;  %v110_v9 = vld [vmem:[#allocation5 + $0x50] sm:$0xff]  ;;  %v206_v10 = vld [vmem:[#allocation7 + $0x60] sm:$0xff]  ;;  %v109_v11 = vld [vmem:[#allocation5 + $0x48] sm:$0xff]  ;;  %s815_s18 = scalar_lea.vmem %s483_s17, 128  ;;  %p820_p12 = scmp.lt.s32.totalorder %s483_s17, %s483_s17 }
  0x40   :  { %567 = vmatprep.subr.mxu0 %v850_v0  ;;  %602 = vmatprep.subr.mxu1 %v850_v0  ;;  %v205_v12 = vld [vmem:[#allocation7 + $0x58] sm:$0xff]  ;;  %v108_v13 = vld [vmem:[#allocation5 + $0x40] sm:$0xff]  ;;  %v204_v14 = vld [vmem:[#allocation7 + $0x50] sm:$0xff]  ;;  %p816_p11 = scmp.ne.s32.totalorder %s483_s17, %s815_s18  ;;  %p821_p13 = scmp.lt.s32.totalorder %s815_s18, %s815_s18 }
  0x41   :  { %568 = vmatpush3.msra.mxu0 %v114_v2  ;;  %603 = vmatpush3.msra.mxu1 %v208_v7  ;;  %v107_v15 = vld [vmem:[#allocation5 + $0x38] sm:$0xff]  ;;  %v203_v16 = vld [vmem:[#allocation7 + $0x48] sm:$0xff]  ;;  %v106_v17 = vld [vmem:[#allocation5 + $0x30] sm:$0xff] }
  0x42   :  { %569 = vmatprep.subr.mxu0 %v850_v0  ;;  %604 = vmatprep.subr.mxu1 %v850_v0  ;;  %v202_v18 = vld [vmem:[#allocation7 + $0x40] sm:$0xff]  ;;  %v105_v19 = vld [vmem:[#allocation5 + $0x28] sm:$0xff]  ;;  %v201_v20 = vld [vmem:[#allocation7 + $0x38] sm:$0xff]  ;;  %p822_p0 = por %p821_p13, %p820_p12 }
  0x43   :  { %570 = vmatpush3.msra.mxu0 %v113_v3  ;;  %605 = vmatpush3.msra.mxu1 %v207_v8  ;;  %v104_v21 = vld [vmem:[#allocation5 + $0x20] sm:$0xff]  ;;  %v200_v22 = vld [vmem:[#allocation7 + $0x30] sm:$0xff]  ;;  %v103_v23 = vld [vmem:[#allocation5 + $0x18] sm:$0xff] }
  0x44   :  { %571 = vmatprep.subr.mxu0 %v850_v0  ;;  %606 = vmatprep.subr.mxu1 %v850_v0  ;;  %v199_v24 = vld [vmem:[#allocation7 + $0x28] sm:$0xff]  ;;  %v102_v25 = vld [vmem:[#allocation5 + $0x10] sm:$0xff]  ;;  %v198_v26 = vld [vmem:[#allocation7 + $0x20] sm:$0xff]  ;;  %p823_p1 = pnand %p822_p0, %p816_p11 }
  0x45   :  { %572 = vmatpush3.msra.mxu0 %v112_v4  ;;  %607 = vmatpush3.msra.mxu1 %v206_v10  ;;  %v101_v27 = vld [vmem:[#allocation5 + $0x8] sm:$0xff]  ;;  %v197_v28 = vld [vmem:[#allocation7 + $0x18] sm:$0xff]  ;;  %v100_v29 = vld [vmem:[#allocation5] sm:$0xff] }
  0x46   :  { %573 = vmatprep.subr.mxu0 %v850_v0  ;;  %608 = vmatprep.subr.mxu1 %v850_v0  ;;  %v99_v30 = vld [vmem:[#allocation2] sm:$0xff]  ;;  %v196_v31 = vld [vmem:[#allocation7 + $0x10] sm:$0xff]  ;;  %v195_v32 = vld [vmem:[#allocation7 + $0x8] sm:$0xff] }
  0x47   :  { %574 = vmatpush3.msra.mxu0 %v111_v6  ;;  %609 = vmatpush3.msra.mxu1 %v205_v12  ;;  %v194_v33 = vld [vmem:[#allocation7] sm:$0xff]  ;;  %v303_v34 = vld [vmem:[#allocation8 + $0x78] sm:$0xff]  ;;  %v302_v35 = vld [vmem:[#allocation8 + $0x70] sm:$0xff] }
  0x48   :  { %575 = vmatprep.subr.mxu0 %v850_v0  ;;  %610 = vmatprep.subr.mxu1 %v850_v0  ;;  %v301_v36 = vld [vmem:[#allocation8 + $0x68] sm:$0xff]  ;;  %v300_v37 = vld [vmem:[#allocation8 + $0x60] sm:$0xff]  ;;  %v299_v38 = vld [vmem:[#allocation8 + $0x58] sm:$0xff] }
  0x49   :  { %576 = vmatpush3.msra.mxu0 %v110_v9  ;;  %611 = vmatpush3.msra.mxu1 %v204_v14  ;;  %v298_v39 = vld [vmem:[#allocation8 + $0x50] sm:$0xff]  ;;  %v297_v40 = vld [vmem:[#allocation8 + $0x48] sm:$0xff]  ;;  %v296_v41 = vld [vmem:[#allocation8 + $0x40] sm:$0xff] }
  0x4a   :  { %577 = vmatprep.subr.mxu0 %v850_v0  ;;  %612 = vmatprep.subr.mxu1 %v850_v0  ;;  %v295_v42 = vld [vmem:[#allocation8 + $0x38] sm:$0xff]  ;;  %v294_v43 = vld [vmem:[#allocation8 + $0x30] sm:$0xff]  ;;  %v293_v44 = vld [vmem:[#allocation8 + $0x28] sm:$0xff] }
  0x4b   :  { %578 = vmatpush3.msra.mxu0 %v109_v11  ;;  %613 = vmatpush3.msra.mxu1 %v203_v16  ;;  %v292_v45 = vld [vmem:[#allocation8 + $0x20] sm:$0xff]  ;;  %v291_v46 = vld [vmem:[#allocation8 + $0x18] sm:$0xff]  ;;  %v290_v52 = vld [vmem:[#allocation8 + $0x10] sm:$0xff] }
  0x4c   :  { %579 = vmatprep.subr.mxu0 %v850_v0  ;;  %614 = vmatprep.subr.mxu1 %v850_v0  ;;  %v493_v47 = vld [vmem:[%s1019_s2] ss:$0 sm:$0xff]  ;;  %v289_v53 = vld [vmem:[#allocation8 + $0x8] sm:$0xff]  ;;  %v288_v54 = vld [vmem:[#allocation8] sm:$0xff] }
  0x4d   :  { %580 = vmatpush3.msra.mxu0 %v108_v13  ;;  %615 = vmatpush3.msra.mxu1 %v202_v18  ;;  %v397_v55 = vld [vmem:[#allocation10 + $0x78] sm:$0xff]  ;;  %v396_v56 = vld [vmem:[#allocation10 + $0x70] sm:$0xff]  ;;  %v395_v57 = vld [vmem:[#allocation10 + $0x68] sm:$0xff] }
  0x4e   :  { %581 = vmatprep.subr.mxu0 %v850_v0  ;;  %616 = vmatprep.subr.mxu1 %v850_v0  ;;  %v394_v58 = vld [vmem:[#allocation10 + $0x60] sm:$0xff]  ;;  %v393_v59 = vld [vmem:[#allocation10 + $0x58] sm:$0xff]  ;;  %v392_v60 = vld [vmem:[#allocation10 + $0x50] sm:$0xff] }
  0x4f   :  { %582 = vmatpush3.msra.mxu0 %v107_v15  ;;  %617 = vmatpush3.msra.mxu1 %v201_v20  ;;  %v391_v61 = vld [vmem:[#allocation10 + $0x48] sm:$0xff]  ;;  %v390_v62 = vld [vmem:[#allocation10 + $0x40] sm:$0xff]  ;;  %v389_v63 = vld [vmem:[#allocation10 + $0x38] sm:$0xff] }
  0x50   :  { %583 = vmatprep.subr.mxu0 %v850_v0  ;;  %618 = vmatprep.subr.mxu1 %v850_v0  ;;  %v388_v1 = vld [vmem:[#allocation10 + $0x30] sm:$0xff]  ;;  %v387_v2 = vld [vmem:[#allocation10 + $0x28] sm:$0xff]  ;;  %v386_v3 = vld [vmem:[#allocation10 + $0x20] sm:$0xff] }
  0x51   :  { %584 = vmatpush3.msra.mxu0 %v106_v17  ;;  %619 = vmatpush3.msra.mxu1 %v200_v22  ;;  %v385_v4 = vld [vmem:[#allocation10 + $0x18] sm:$0xff]  ;;  %v384_v10 = vld [vmem:[#allocation10 + $0x10] sm:$0xff]  ;;  %v383_v11 = vld [vmem:[#allocation10 + $0x8] sm:$0xff] }
  0x52   :  { %585 = vmatprep.subr.mxu0 %v850_v0  ;;  %620 = vmatprep.subr.mxu1 %v850_v0  ;;  %v494_v5 = vld [vmem:[%s1021_s4] ss:$0 sm:$0xff]  ;;  %v382_v12 = vld [vmem:[#allocation10] sm:$0xff] }
  0x53   :  { %586 = vmatpush3.msra.mxu0 %v105_v19  ;;  %621 = vmatpush3.msra.mxu1 %v199_v24  ;;  %v495_v13 = vld [vmem:[%s1023_s6] ss:$0 sm:$0xff] }
  0x54   :  { %587 = vmatprep.subr.mxu0 %v850_v0  ;;  %622 = vmatprep.subr.mxu1 %v850_v0  ;;  %v496_v18 = vld [vmem:[%s1025_s8] ss:$0 sm:$0xff] }
  0x55   :  { %588 = vmatpush3.msra.mxu0 %v104_v21  ;;  %623 = vmatpush3.msra.mxu1 %v198_v26 }
  0x56   :  { %589 = vmatprep.subr.mxu0 %v850_v0  ;;  %624 = vmatprep.subr.mxu1 %v850_v0 }
  0x57   :  { %590 = vmatpush3.msra.mxu0 %v103_v23  ;;  %625 = vmatpush3.msra.mxu1 %v197_v28 }
  0x58   :  { %591 = vmatprep.subr.mxu0 %v850_v0  ;;  %626 = vmatprep.subr.mxu1 %v850_v0 }
  0x59   :  { %592 = vmatpush3.msra.mxu0 %v102_v25  ;;  %627 = vmatpush3.msra.mxu1 %v196_v31 }
  0x5a   :  { %593 = vmatprep.subr.mxu0 %v850_v0  ;;  %628 = vmatprep.subr.mxu1 %v850_v0 }
  0x5b   :  { %594 = vmatpush3.msra.mxu0 %v101_v27  ;;  %629 = vmatpush3.msra.mxu1 %v195_v32 }
  0x5c   :  { %595 = vmatprep.subr.mxu0 %v850_v0  ;;  %630 = vmatprep.subr.mxu1 %v850_v0 }
  0x5d   :  { %596 = vmatpush3.msra.mxu0 %v100_v29  ;;  %631 = vmatpush3.msra.mxu1 %v194_v33 }
  0x5e   :  { %598 = vmatmul.mubr.f32.vlgmr.msra.gmra.mxu0 %v99_v30  ;;  %635 = vmatprep.subr.mxu0 %v850_v0 }
  0x5f   :  { %667 = vmatprep.mubr.msk.f32.mxu0 %vm851_vm0, %v850_v0  ;;  %670 = vmatprep.subr.mxu1 %v850_v0 }
  0x60   :  { %636 = vmatpush3.msra.mxu0 %v303_v34 }
  0x61   :  { %637 = vmatprep.subr.mxu0 %v850_v0 }
  0x62   :  { %638 = vmatpush3.msra.mxu0 %v302_v35 }
  0x63   :  { %639 = vmatprep.subr.mxu0 %v850_v0 }
  0x64   :  { %640 = vmatpush3.msra.mxu0 %v301_v36 }
  0x65   :  { %641 = vmatprep.subr.mxu0 %v850_v0 }
  0x66   :  { %642 = vmatpush3.msra.mxu0 %v300_v37 }
  0x67   :  { %643 = vmatprep.subr.mxu0 %v850_v0 }
  0x68   :  { %644 = vmatpush3.msra.mxu0 %v299_v38 }
  0x69   :  { %645 = vmatprep.subr.mxu0 %v850_v0 }
  0x6a   :  { %646 = vmatpush3.msra.mxu0 %v298_v39 }
  0x6b   :  { %647 = vmatprep.subr.mxu0 %v850_v0 }
  0x6c   :  { %648 = vmatpush3.msra.mxu0 %v297_v40 }
  0x6d   :  { %649 = vmatprep.subr.mxu0 %v850_v0 }
  0x6e   :  { %650 = vmatpush3.msra.mxu0 %v296_v41 }
  0x6f   :  { %651 = vmatprep.subr.mxu0 %v850_v0 }
  0x70   :  { %652 = vmatpush3.msra.mxu0 %v295_v42 }
  0x71   :  { %653 = vmatprep.subr.mxu0 %v850_v0 }
  0x72   :  { %654 = vmatpush3.msra.mxu0 %v294_v43 }
  0x73   :  { %655 = vmatprep.subr.mxu0 %v850_v0 }
  0x74   :  { %656 = vmatpush3.msra.mxu0 %v293_v44 }
  0x75   :  { %657 = vmatprep.subr.mxu0 %v850_v0 }
  0x76   :  { %658 = vmatpush3.msra.mxu0 %v292_v45 }
  0x77   :  { %659 = vmatprep.subr.mxu0 %v850_v0 }
  0x78   :  { %660 = vmatpush3.msra.mxu0 %v291_v46 }
  0x79   :  { %661 = vmatprep.subr.mxu0 %v850_v0 }
  0x7a   :  { %662 = vmatpush3.msra.mxu0 %v290_v52 }
  0x7b   :  { %663 = vmatprep.subr.mxu0 %v850_v0 }
  0x7c   :  { %664 = vmatpush3.msra.mxu0 %v289_v53 }
  0x7d   :  { %665 = vmatprep.subr.mxu0 %v850_v0 }
  0x7e   :  { %666 = vmatpush3.msra.mxu0 %v288_v54 }
 0x11e   :  { %v189_v48 = vpop.f32.mrf.mxu0 }
 0x11f   :  { %v190_v49 = vadd.f32 %v493_v47, %v189_v48 }
 0x120   :  { %v599_v50 = vpop.f32.mrf.mxu0 }
 0x121   :  { %v193_v51 = vmax.f32 %v190_v49, 0.0 }
 0x123   :  { %633 = vmatmul.mubr.f32.vlgmr.msra.gmra.mxu1 %v193_v51 }
 0x124   :  { %702 = vmatprep.mubr.msk.f32.mxu1 %vm851_vm0, %v850_v0  ;;  %671 = vmatpush3.msra.mxu1 %v397_v55 }
 0x125   :  { %672 = vmatprep.subr.mxu1 %v850_v0 }
 0x126   :  { %673 = vmatpush3.msra.mxu1 %v396_v56 }
 0x127   :  { %674 = vmatprep.subr.mxu1 %v850_v0 }
 0x128   :  { %675 = vmatpush3.msra.mxu1 %v395_v57 }
 0x129   :  { %676 = vmatprep.subr.mxu1 %v850_v0 }
 0x12a   :  { %677 = vmatpush3.msra.mxu1 %v394_v58 }
 0x12b   :  { %678 = vmatprep.subr.mxu1 %v850_v0 }
 0x12c   :  { %679 = vmatpush3.msra.mxu1 %v393_v59 }
 0x12d   :  { %680 = vmatprep.subr.mxu1 %v850_v0 }
 0x12e   :  { %681 = vmatpush3.msra.mxu1 %v392_v60 }
 0x12f   :  { %682 = vmatprep.subr.mxu1 %v850_v0 }
 0x130   :  { %683 = vmatpush3.msra.mxu1 %v391_v61 }
 0x131   :  { %684 = vmatprep.subr.mxu1 %v850_v0 }
 0x132   :  { %685 = vmatpush3.msra.mxu1 %v390_v62 }
 0x133   :  { %686 = vmatprep.subr.mxu1 %v850_v0 }
 0x134   :  { %687 = vmatpush3.msra.mxu1 %v389_v63 }
 0x135   :  { %688 = vmatprep.subr.mxu1 %v850_v0 }
 0x136   :  { %689 = vmatpush3.msra.mxu1 %v388_v1 }
 0x137   :  { %690 = vmatprep.subr.mxu1 %v850_v0 }
 0x138   :  { %691 = vmatpush3.msra.mxu1 %v387_v2 }
 0x139   :  { %692 = vmatprep.subr.mxu1 %v850_v0 }
 0x13a   :  { %693 = vmatpush3.msra.mxu1 %v386_v3 }
 0x13b   :  { %694 = vmatprep.subr.mxu1 %v850_v0 }
 0x13c   :  { %695 = vmatpush3.msra.mxu1 %v385_v4 }
 0x13d   :  { %696 = vmatprep.subr.mxu1 %v850_v0 }
 0x13e   :  { %697 = vmatpush3.msra.mxu1 %v384_v10 }
 0x13f   :  { %698 = vmatprep.subr.mxu1 %v850_v0 }
 0x140   :  { %699 = vmatpush3.msra.mxu1 %v383_v11 }
 0x141   :  { %700 = vmatprep.subr.mxu1 %v850_v0 }
 0x142   :  { %701 = vmatpush3.msra.mxu1 %v382_v12 }
 0x1e3   :  { %v283_v6 = vpop.f32.mrf.mxu1 }
 0x1e4   :  { %v284_v7 = vadd.f32 %v494_v5, %v283_v6 }
 0x1e5   :  { %v634_v8 = vpop.f32.mrf.mxu1 }
 0x1e6   :  { %v287_v9 = vmax.f32 %v284_v7, 0.0 }
 0x1e8   :  { %668 = vmatmul.mubr.f32.vlgmr.msra.gmra.mxu0 %v287_v9 }
 0x2a8   :  { %v377_v14 = vpop.f32.mrf.mxu0 }
 0x2a9   :  { %v378_v15 = vadd.f32 %v495_v13, %v377_v14 }
 0x2aa   :  { %v669_v16 = vpop.f32.mrf.mxu0 }
 0x2ab   :  { %v381_v17 = vmax.f32 %v378_v15, 0.0 }
 0x2ad   :  { %703 = vmatmul.mubr.f32.vlgmr.msra.gmra.mxu1 %v381_v17 }
 0x36d   :  { %v471_v19 = vpop.f32.mrf.mxu1 }
 0x36e   :  { %v472_v20 = vadd.f32 %v496_v18, %v471_v19 }
 0x36f   :  { %v704_v0 = vpop.f32.mrf.mxu1 }
 0x370   :  { %475 = vst [vmem:[#allocation11] sm:$0xff] %v472_v20 }
 0x371   :  { %826 = shalt.err (!%p823_p1)
}
 0x372   :  { %485 = dma.vmem_to_hbm [thread:$0]  %s483_s17, 128, %s1026_s9, [#allocation4]  }
 0x373   :  { %841 = dma.done.wait [#allocation4], 128  }
 0x374   :  { %842 = vsyncadd [#allocation4], 4294967168 }
 0x375   :  { %489 = vsyncpa [#allocation3], 1 }
 0x376   :  { %490 = vsyncpa [#allocation6], 1 }
 0x377   :  { %491 = vsyncpa [#allocation9], 1 }
 0x378   :  { %492 = vsyncpa [#allocation4], 1 }

</bundles_post_ra>
